<compile_context>
chip_gen: v7x
topology: tpu7x:2x2x1
jax: 0.10.0
libtpu: 0.0.40
codegen_flags: <defaults>
</compile_context>

<pallas_src>
import jax
import jax.numpy as jnp
from jax.experimental import pallas as pl
from jax.experimental.pallas import tpu as pltpu

EPS = 1e-5


def _bn_tanh(h, gamma, beta, inv_b):
    # BatchNorm1d training mode (batch mean, biased batch var), one-pass stats,
    # followed by Tanh.  rsqrt/tanh go to the EUP slot.
    s1 = jnp.sum(h, axis=0, keepdims=True)
    s2 = jnp.sum(h * h, axis=0, keepdims=True)
    mu = s1 * inv_b
    var = s2 * inv_b - mu * mu
    hn = (h - mu) * jax.lax.rsqrt(var + EPS) * gamma + beta
    return jnp.tanh(hn)


def variation_kernel(x_ref, noise_ref, w1_ref, w2_ref, wms_ref, vecs_ref, o_ref):
    x = x_ref[0]          # (B, D_in) f32
    noise = noise_ref[0]  # (B, Z)    f32
    vecs = vecs_ref[...]  # (8, Z)    f32  -- packed per-feature parameters

    b1 = vecs[0:1, :]
    g1 = vecs[1:2, :]
    be1 = vecs[2:3, :]
    b2 = vecs[3:4, :]
    g2 = vecs[4:5, :]
    be2 = vecs[5:6, :]
    b_mu = vecs[6:7, :]
    b_sig = vecs[7:8, :]

    batch = x.shape[0]
    z = vecs.shape[1]
    inv_b = 1.0 / batch
    mxu = w1_ref.dtype  # bf16 if caller pre-cast weights; elementwise stays f32

    # fc: Linear -> BN -> Tanh -> Linear -> BN -> Tanh
    h = jnp.dot(x.astype(mxu), w1_ref[...], preferred_element_type=jnp.float32) + b1
    h = _bn_tanh(h, g1, be1, inv_b)
    h = jnp.dot(h.astype(mxu), w2_ref[...], preferred_element_type=jnp.float32) + b2
    h = _bn_tanh(h, g2, be2, inv_b)

    # linear_mu | linear_sigma fused into one lane-dense (Z, 2Z) matmul.
    heads = jnp.dot(h.astype(mxu), wms_ref[...], preferred_element_type=jnp.float32)
    mus = heads[:, :z] + b_mu
    log_sqr_sigmas = heads[:, z:] + b_sig

    stds = jnp.exp(0.5 * log_sqr_sigmas)
    o_ref[0] = (noise * stds + mus).astype(o_ref.dtype)


def init_variation_params(key, input_size, z_size):
    """Mirror the PyTorch init_weights: Linear weights ~ U(-0.02, 0.02),
    biases 0; BatchNorm gamma=1, beta=0."""
    k1, k2, k3, k4 = jax.random.split(key, 4)

    def u(k, shape):
        return jax.random.uniform(k, shape, jnp.float32, -0.02, 0.02)

    z = z_size
    return dict(
        # PyTorch Linear stores (out, in); we keep (in, out) for x @ W.
        w1=u(k1, (input_size, z)), b1=jnp.zeros((z,), jnp.float32),
        g1=jnp.ones((z,), jnp.float32), be1=jnp.zeros((z,), jnp.float32),
        w2=u(k2, (z, z)), b2=jnp.zeros((z,), jnp.float32),
        g2=jnp.ones((z,), jnp.float32), be2=jnp.zeros((z,), jnp.float32),
        w_mu=u(k3, (z, z)), b_mu=jnp.zeros((z,), jnp.float32),
        w_sigma=u(k4, (z, z)), b_sigma=jnp.zeros((z,), jnp.float32),
    )


def variation_forward(x, noise, params, *, matmul_dtype=jnp.float32):
    """x: (G, B, D_in) or (B, D_in); noise: matching (..., B, Z) standard normals.

    G is a stack of *independent* BatchNorm batches; each grid step processes
    one full batch so BN statistics match PyTorch training mode exactly.
    matmul_dtype=jnp.bfloat16 enables bf16 MXU operands on v6e/v7x (elementwise
    math stays f32).
    """
    squeeze = x.ndim == 2
    if squeeze:
        x = x[None]
        noise = noise[None]
    G, B, Din = x.shape
    Z = params["w1"].shape[1]

    w1 = params["w1"].astype(matmul_dtype)
    w2 = params["w2"].astype(matmul_dtype)
    # Fuse the two output heads into one lane-dense (Z, 2Z) weight.
    wms = jnp.concatenate([params["w_mu"], params["w_sigma"]], axis=1).astype(matmul_dtype)
    # Pack the eight per-feature vectors into a single (8, Z) input (one DMA).
    vecs = jnp.stack(
        [params["b1"], params["g1"], params["be1"],
         params["b2"], params["g2"], params["be2"],
         params["b_mu"], params["b_sigma"]],
        axis=0,
    ).astype(jnp.float32)

    out = pl.pallas_call(
        variation_kernel,
        out_shape=jax.ShapeDtypeStruct((G, B, Z), jnp.float32),
        grid=(G,),
        in_specs=[
            pl.BlockSpec((1, B, Din), lambda g: (g, 0, 0)),   # x
            pl.BlockSpec((1, B, Z), lambda g: (g, 0, 0)),     # noise
            pl.BlockSpec((Din, Z), lambda g: (0, 0)),         # w1
            pl.BlockSpec((Z, Z), lambda g: (0, 0)),           # w2
            pl.BlockSpec((Z, 2 * Z), lambda g: (0, 0)),       # [w_mu | w_sigma]
            pl.BlockSpec((8, Z), lambda g: (0, 0)),           # packed vectors
        ],
        out_specs=pl.BlockSpec((1, B, Z), lambda g: (g, 0, 0)),
        compiler_params=pltpu.CompilerParams(
            dimension_semantics=("parallel",)),
    )(x, noise, w1, w2, wms, vecs)
    return out[0] if squeeze else out


def variation_ref(x, noise, params):
    """Pure-JAX reference (two-pass BN, unfused heads) for sanity checking."""

    def bn(h, g, b):
        mu = jnp.mean(h, axis=0, keepdims=True)
        var = jnp.mean((h - mu) ** 2, axis=0, keepdims=True)
        return (h - mu) / jnp.sqrt(var + EPS) * g + b

    def one(xb, nb):
        h = xb @ params["w1"] + params["b1"]
        h = jnp.tanh(bn(h, params["g1"], params["be1"]))
        h = h @ params["w2"] + params["b2"]
        h = jnp.tanh(bn(h, params["g2"], params["be2"]))
        mus = h @ params["w_mu"] + params["b_mu"]
        logs = h @ params["w_sigma"] + params["b_sigma"]
        return nb * jnp.exp(0.5 * logs) + mus

    if x.ndim == 2:
        return one(x, noise)
    return jax.vmap(one)(x, noise)


if __name__ == "__main__":
    input_size, z_size, batch, groups = 16, 32, 8, 2

    key = jax.random.PRNGKey(0)
    kp, kx, kn = jax.random.split(key, 3)
    params = init_variation_params(kp, input_size, z_size)
    x = jax.random.normal(kx, (groups, batch, input_size), jnp.float32)
    noise = jax.random.normal(kn, (groups, batch, z_size), jnp.float32)

    out = variation_forward(x, noise, params)
    out = jax.block_until_ready(out)

    ref = variation_ref(x, noise, params)
    assert out.shape == (groups, batch, z_size), out.shape
    assert jnp.allclose(out, ref, atol=1e-4, rtol=1e-4), (out, ref)
    print("KERNEL_OK")
</pallas_src>

<mosaic_0001>
module attributes {stable_mosaic.version = 11 : i64} {
  func.func @variation_kernel(%arg0: i32, %arg1: memref<1x8x16xf32, #tpu.memory_space<vmem>>, %arg2: memref<1x8x32xf32, #tpu.memory_space<vmem>>, %arg3: memref<16x32xf32, #tpu.memory_space<vmem>>, %arg4: memref<32x32xf32, #tpu.memory_space<vmem>>, %arg5: memref<32x64xf32, #tpu.memory_space<vmem>>, %arg6: memref<8x32xf32, #tpu.memory_space<vmem>>, %arg7: memref<1x8x32xf32, #tpu.memory_space<vmem>>) attributes {dimension_semantics = [#tpu.dimension_semantics<parallel>], iteration_bounds = array<i64: 2>, scalar_prefetch = 0 : i64, scratch_operands = 0 : i64, tpu.core_type = #tpu.core_type<tc>, window_params = [{transform_indices = @transform_0, window_bounds = array<i64: 1, 8, 16>}, {transform_indices = @transform_1, window_bounds = array<i64: 1, 8, 32>}, {pipeline_mode = #tpu.pipeline_mode<synchronous>, transform_indices = @transform_2, window_bounds = array<i64: 16, 32>}, {pipeline_mode = #tpu.pipeline_mode<synchronous>, transform_indices = @transform_3, window_bounds = array<i64: 32, 32>}, {pipeline_mode = #tpu.pipeline_mode<synchronous>, transform_indices = @transform_4, window_bounds = array<i64: 32, 64>}, {pipeline_mode = #tpu.pipeline_mode<synchronous>, transform_indices = @transform_5, window_bounds = array<i64: 8, 32>}, {transform_indices = @transform_6, window_bounds = array<i64: 1, 8, 32>}]} {
    %c0 = arith.constant 0 : index
    %c0_0 = arith.constant 0 : index
    %c0_1 = arith.constant 0 : index
    %0 = vector.load %arg1[%c0, %c0_0, %c0_1] : memref<1x8x16xf32, #tpu.memory_space<vmem>>, vector<1x8x16xf32>
    %1 = vector.shape_cast %0 : vector<1x8x16xf32> to vector<8x16xf32>
    %c0_2 = arith.constant 0 : index
    %c0_3 = arith.constant 0 : index
    %c0_4 = arith.constant 0 : index
    %2 = vector.load %arg2[%c0_2, %c0_3, %c0_4] : memref<1x8x32xf32, #tpu.memory_space<vmem>>, vector<1x8x32xf32>
    %3 = vector.shape_cast %2 : vector<1x8x32xf32> to vector<8x32xf32>
    %c0_5 = arith.constant 0 : index
    %c0_6 = arith.constant 0 : index
    %4 = vector.load %arg6[%c0_5, %c0_6] : memref<8x32xf32, #tpu.memory_space<vmem>>, vector<8x32xf32>
    %5 = vector.extract_strided_slice %4 {offsets = [0, 0], sizes = [1, 32], strides = [1, 1]} : vector<8x32xf32> to vector<1x32xf32>
    %6 = vector.extract_strided_slice %4 {offsets = [1, 0], sizes = [1, 32], strides = [1, 1]} : vector<8x32xf32> to vector<1x32xf32>
    %7 = vector.extract_strided_slice %4 {offsets = [2, 0], sizes = [1, 32], strides = [1, 1]} : vector<8x32xf32> to vector<1x32xf32>
    %8 = vector.extract_strided_slice %4 {offsets = [3, 0], sizes = [1, 32], strides = [1, 1]} : vector<8x32xf32> to vector<1x32xf32>
    %9 = vector.extract_strided_slice %4 {offsets = [4, 0], sizes = [1, 32], strides = [1, 1]} : vector<8x32xf32> to vector<1x32xf32>
    %10 = vector.extract_strided_slice %4 {offsets = [5, 0], sizes = [1, 32], strides = [1, 1]} : vector<8x32xf32> to vector<1x32xf32>
    %11 = vector.extract_strided_slice %4 {offsets = [6, 0], sizes = [1, 32], strides = [1, 1]} : vector<8x32xf32> to vector<1x32xf32>
    %12 = vector.extract_strided_slice %4 {offsets = [7, 0], sizes = [1, 32], strides = [1, 1]} : vector<8x32xf32> to vector<1x32xf32>
    %c0_7 = arith.constant 0 : index
    %c0_8 = arith.constant 0 : index
    %13 = vector.load %arg3[%c0_7, %c0_8] : memref<16x32xf32, #tpu.memory_space<vmem>>, vector<16x32xf32>
    %cst = arith.constant dense<0.000000e+00> : vector<8x32xf32>
    %14 = tpu.matmul %1, %13, %cst {dimension_numbers = #tpu.dot_dimension_numbers<[1], [0], [0], [1], [0, 0, 1, 1], [], []>} : vector<8x16xf32>, vector<16x32xf32>, vector<8x32xf32> -> vector<8x32xf32>
    %15 = vector.broadcast %5 : vector<1x32xf32> to vector<8x32xf32>
    %16 = arith.addf %14, %15 : vector<8x32xf32>
    %cst_9 = arith.constant dense<0.000000e+00> : vector<32xf32>
    %17 = vector.multi_reduction <add>, %16, %cst_9 [0] : vector<8x32xf32> to vector<32xf32>
    %18 = vector.shape_cast %17 : vector<32xf32> to vector<1x32xf32>
    %19 = arith.mulf %16, %16 : vector<8x32xf32>
    %cst_10 = arith.constant dense<0.000000e+00> : vector<32xf32>
    %20 = vector.multi_reduction <add>, %19, %cst_10 [0] : vector<8x32xf32> to vector<32xf32>
    %21 = vector.shape_cast %20 : vector<32xf32> to vector<1x32xf32>
    %cst_11 = arith.constant 1.250000e-01 : f32
    %22 = vector.broadcast %cst_11 : f32 to vector<1x32xf32>
    %23 = arith.mulf %18, %22 : vector<1x32xf32>
    %cst_12 = arith.constant 1.250000e-01 : f32
    %24 = vector.broadcast %cst_12 : f32 to vector<1x32xf32>
    %25 = arith.mulf %21, %24 : vector<1x32xf32>
    %26 = arith.mulf %23, %23 : vector<1x32xf32>
    %27 = arith.subf %25, %26 : vector<1x32xf32>
    %28 = vector.broadcast %23 : vector<1x32xf32> to vector<8x32xf32>
    %29 = arith.subf %16, %28 : vector<8x32xf32>
    %cst_13 = arith.constant 9.99999974E-6 : f32
    %30 = vector.broadcast %cst_13 : f32 to vector<1x32xf32>
    %31 = arith.addf %27, %30 : vector<1x32xf32>
    %32 = math.rsqrt %31 : vector<1x32xf32>
    %33 = vector.broadcast %32 : vector<1x32xf32> to vector<8x32xf32>
    %34 = arith.mulf %29, %33 : vector<8x32xf32>
    %35 = vector.broadcast %6 : vector<1x32xf32> to vector<8x32xf32>
    %36 = arith.mulf %34, %35 : vector<8x32xf32>
    %37 = vector.broadcast %7 : vector<1x32xf32> to vector<8x32xf32>
    %38 = arith.addf %36, %37 : vector<8x32xf32>
    %39 = math.tanh %38 : vector<8x32xf32>
    %c0_14 = arith.constant 0 : index
    %c0_15 = arith.constant 0 : index
    %40 = vector.load %arg4[%c0_14, %c0_15] : memref<32x32xf32, #tpu.memory_space<vmem>>, vector<32x32xf32>
    %cst_16 = arith.constant dense<0.000000e+00> : vector<8x32xf32>
    %41 = tpu.matmul %39, %40, %cst_16 {dimension_numbers = #tpu.dot_dimension_numbers<[1], [0], [0], [1], [0, 0, 1, 1], [], []>} : vector<8x32xf32>, vector<32x32xf32>, vector<8x32xf32> -> vector<8x32xf32>
    %42 = vector.broadcast %8 : vector<1x32xf32> to vector<8x32xf32>
    %43 = arith.addf %41, %42 : vector<8x32xf32>
    %cst_17 = arith.constant dense<0.000000e+00> : vector<32xf32>
    %44 = vector.multi_reduction <add>, %43, %cst_17 [0] : vector<8x32xf32> to vector<32xf32>
    %45 = vector.shape_cast %44 : vector<32xf32> to vector<1x32xf32>
    %46 = arith.mulf %43, %43 : vector<8x32xf32>
    %cst_18 = arith.constant dense<0.000000e+00> : vector<32xf32>
    %47 = vector.multi_reduction <add>, %46, %cst_18 [0] : vector<8x32xf32> to vector<32xf32>
    %48 = vector.shape_cast %47 : vector<32xf32> to vector<1x32xf32>
    %cst_19 = arith.constant 1.250000e-01 : f32
    %49 = vector.broadcast %cst_19 : f32 to vector<1x32xf32>
    %50 = arith.mulf %45, %49 : vector<1x32xf32>
    %cst_20 = arith.constant 1.250000e-01 : f32
    %51 = vector.broadcast %cst_20 : f32 to vector<1x32xf32>
    %52 = arith.mulf %48, %51 : vector<1x32xf32>
    %53 = arith.mulf %50, %50 : vector<1x32xf32>
    %54 = arith.subf %52, %53 : vector<1x32xf32>
    %55 = vector.broadcast %50 : vector<1x32xf32> to vector<8x32xf32>
    %56 = arith.subf %43, %55 : vector<8x32xf32>
    %cst_21 = arith.constant 9.99999974E-6 : f32
    %57 = vector.broadcast %cst_21 : f32 to vector<1x32xf32>
    %58 = arith.addf %54, %57 : vector<1x32xf32>
    %59 = math.rsqrt %58 : vector<1x32xf32>
    %60 = vector.broadcast %59 : vector<1x32xf32> to vector<8x32xf32>
    %61 = arith.mulf %56, %60 : vector<8x32xf32>
    %62 = vector.broadcast %9 : vector<1x32xf32> to vector<8x32xf32>
    %63 = arith.mulf %61, %62 : vector<8x32xf32>
    %64 = vector.broadcast %10 : vector<1x32xf32> to vector<8x32xf32>
    %65 = arith.addf %63, %64 : vector<8x32xf32>
    %66 = math.tanh %65 : vector<8x32xf32>
    %c0_22 = arith.constant 0 : index
    %c0_23 = arith.constant 0 : index
    %67 = vector.load %arg5[%c0_22, %c0_23] : memref<32x64xf32, #tpu.memory_space<vmem>>, vector<32x64xf32>
    %cst_24 = arith.constant dense<0.000000e+00> : vector<8x64xf32>
    %68 = tpu.matmul %66, %67, %cst_24 {dimension_numbers = #tpu.dot_dimension_numbers<[1], [0], [0], [1], [0, 0, 1, 1], [], []>} : vector<8x32xf32>, vector<32x64xf32>, vector<8x64xf32> -> vector<8x64xf32>
    %69 = vector.extract_strided_slice %68 {offsets = [0, 0], sizes = [8, 32], strides = [1, 1]} : vector<8x64xf32> to vector<8x32xf32>
    %70 = vector.broadcast %11 : vector<1x32xf32> to vector<8x32xf32>
    %71 = arith.addf %69, %70 : vector<8x32xf32>
    %72 = vector.extract_strided_slice %68 {offsets = [0, 32], sizes = [8, 32], strides = [1, 1]} : vector<8x64xf32> to vector<8x32xf32>
    %73 = vector.broadcast %12 : vector<1x32xf32> to vector<8x32xf32>
    %74 = arith.addf %72, %73 : vector<8x32xf32>
    %cst_25 = arith.constant 5.000000e-01 : f32
    %75 = vector.broadcast %cst_25 : f32 to vector<8x32xf32>
    %76 = arith.mulf %75, %74 : vector<8x32xf32>
    %77 = math.exp %76 : vector<8x32xf32>
    %78 = arith.mulf %3, %77 : vector<8x32xf32>
    %79 = arith.addf %78, %71 : vector<8x32xf32>
    %c0_26 = arith.constant 0 : index
    %c0_27 = arith.constant 0 : index
    %c0_28 = arith.constant 0 : index
    %80 = vector.load %arg7[%c0_26, %c0_27, %c0_28] : memref<1x8x32xf32, #tpu.memory_space<vmem>>, vector<1x8x32xf32>
    %81 = vector.shape_cast %80 : vector<1x8x32xf32> to vector<8x32xf32>
    %82 = vector.shape_cast %79 : vector<8x32xf32> to vector<1x8x32xf32>
    tpu.vector_store %arg7[%c0_26, %c0_27, %c0_28], %82 {strides = array<i32>} : memref<1x8x32xf32, #tpu.memory_space<vmem>>, vector<1x8x32xf32>,
    return
  }
  func.func @transform_0(%arg0: i32) -> (i32, i32, i32) {
    %c0_i32 = arith.constant 0 : i32
    %c0_i32_0 = arith.constant 0 : i32
    %c0_i32_1 = arith.constant 0 : i32
    return %arg0, %c0_i32, %c0_i32_0 : i32, i32, i32
  }
  func.func @transform_1(%arg0: i32) -> (i32, i32, i32) {
    %c0_i32 = arith.constant 0 : i32
    %c0_i32_0 = arith.constant 0 : i32
    %c0_i32_1 = arith.constant 0 : i32
    return %arg0, %c0_i32, %c0_i32_0 : i32, i32, i32
  }
  func.func @transform_2(%arg0: i32) -> (i32, i32) {
    %c0_i32 = arith.constant 0 : i32
    %c0_i32_0 = arith.constant 0 : i32
    %c0_i32_1 = arith.constant 0 : i32
    return %c0_i32, %c0_i32_0 : i32, i32
  }
  func.func @transform_3(%arg0: i32) -> (i32, i32) {
    %c0_i32 = arith.constant 0 : i32
    %c0_i32_0 = arith.constant 0 : i32
    %c0_i32_1 = arith.constant 0 : i32
    return %c0_i32, %c0_i32_0 : i32, i32
  }
  func.func @transform_4(%arg0: i32) -> (i32, i32) {
    %c0_i32 = arith.constant 0 : i32
    %c0_i32_0 = arith.constant 0 : i32
    %c0_i32_1 = arith.constant 0 : i32
    return %c0_i32, %c0_i32_0 : i32, i32
  }
  func.func @transform_5(%arg0: i32) -> (i32, i32) {
    %c0_i32 = arith.constant 0 : i32
    %c0_i32_0 = arith.constant 0 : i32
    %c0_i32_1 = arith.constant 0 : i32
    return %c0_i32, %c0_i32_0 : i32, i32
  }
  func.func @transform_6(%arg0: i32) -> (i32, i32, i32) {
    %c0_i32 = arith.constant 0 : i32
    %c0_i32_0 = arith.constant 0 : i32
    %c0_i32_1 = arith.constant 0 : i32
    return %arg0, %c0_i32, %c0_i32_0 : i32, i32, i32
  }
}

</mosaic_0001>

<bundles_post_ra>
// kernel: tpu_custom_call.1
= control target key start
LH: loop header
LB: loop body
LE: loop exit
PB: predicated region body
PF: predicated region fallthrough
CT: control target
= control target key end

     0   :  { %s1607_s0 = inlined_call_operand.hbm [shape: f32[2,8,16], index: 0, kind: input, shape index: {}]   ;;  %s1608_s1 = inlined_call_operand.hbm [shape: f32[2,8,32], index: 1, kind: input, shape index: {}]   ;;  %s1609_s2 = inlined_call_operand.hbm [shape: f32[16,32], index: 2, kind: input, shape index: {}]   ;;  %s1610_s3 = inlined_call_operand.hbm [shape: f32[32,32], index: 3, kind: input, shape index: {}]   ;;  %s1611_s4 = inlined_call_operand.hbm [shape: f32[32,64], index: 4, kind: input, shape index: {}]   ;;  %s1612_s5 = inlined_call_operand.vmem [shape: f32[8,32], index: 5, kind: input, shape index: {}]   ;;  %s1613_s6 = inlined_call_operand.hbm [shape: f32[2,8,32], index: 6, kind: output, shape index: {}]  }
   0x1   :  { %1618 = sst [smem:[#allocation17_spill]] %s1609_s2 }
   0x2   :  { %1619 = sst [smem:[#allocation18_spill]] %s1610_s3 }
   0x3   :  { %1620 = sst [smem:[#allocation19_spill]] %s1611_s4 }
   0x4   :  { %11 = vsyncpa [#allocation3], 0 }
   0x5   :  { %13 = vsyncpa [#allocation3 + $0x1], 0 }
   0x6   :  { %14 = vsyncpa [#allocation6], 0 }
   0x7   :  { %16 = vsyncpa [#allocation6 + $0x1], 0 }
   0x8   :  { %17 = vsyncpa [#allocation9], 0 }
   0x9   :  { %18 = vsyncpa [#allocation4], 0 }
   0xa   :  { %20 = vsyncpa [#allocation4 + $0x1], 0  ;;  %s1268_s21 = smov 0   ;;  %s1270_s22 = smov 0  }
   0xb   :  { %s1272_s23 = smov 0   ;;  %s1274_s24 = smov 0  }
   0xc LB: > { %s1289_s25 = sadd.s32 4294967295, %s1218_s24   ;;  %s816_s26 = sadd.s32 4294967294, %s1218_s24   ;;  %s1218_s24 = sphi %s1274_s24, %s1644_s24   ;;  %s1214_s23 = sphi %s1272_s23, %s1643_s23   ;;  %s1210_s22 = sphi %s1270_s22, %s1642_s22   ;;  %s1206_s21 = sphi %s1268_s21, %s1641_s21  }
   0xd   : > { %p46_p0 = scmp.ne.s32.totalorder %s1210_s22, %s1206_s21  ;;  %p1614_p1 = scmp.eq.s32.totalorder %s1289_s25, 0 }
   0xe   : > { %p186_p3 = scmp.eq.s32.totalorder %s816_s26, 1  ;;  %p817_p5 = scmp.ge.s32.totalorder %s1218_s24, 1 }
   0xf   : > { %p1298_p4 = por %p1614_p1, %p46_p0  ;;  %p193_p7 = scmp.lt.s32.totalorder %s1218_s24, 3 }
  0x10   : > { %p1303_p6 = por %p186_p3, %p46_p0  ;;  %s1220_s30 = smov [#allocation7]  }
  0x11   : > { %s1621_s27 = scalar_select %p1298_p4, 1, 0 }
  0x12   : > { %s1622_s28 = scalar_select %p1303_p6, 1, 0 }
  0x13   : > { %p1308_p8 = pnand %p817_p5, %p193_p7  ;;  %s205_s7 = sshll.u32 %s1220_s30, 4  ;;  %s1312_s7 = int_to_ptr.vmem [resolvable:$true] %s205_s7 }
  0x14   : > { %s1221_s9 = smov [#allocation8]   ;;  %s1222_s11 = smov [#allocation10]  }
  0x15   : > { %s1623_s29 = scalar_select %p1308_p8, 1, 0 }
  0x16   : > { %p915_p9 = pneg %p1308_p8  ;;  %s218_s10 = sshll.u32 %s1221_s9, 4  ;;  %s1323_s10 = int_to_ptr.vmem [resolvable:$true] %s218_s10 }
  0x17   : > { %s1325_s12 = sshll.u32 %s1222_s11, 4  ;;  %s1625_s2 = sld [smem:[#allocation17_spill]]  ;;  %s232_s12 = int_to_ptr.vmem [resolvable:$true] %s1325_s12 }
  0x18   : > { %p1319_p11 = pnand %p915_p9, %p1614_p1 }
  0x1a   : > { %p1335_p13 = pneg %p1319_p11 }
  0x1d   : > { %s996_s15 = scalar_lea.hbm %s1625_s2, 256 }
  0x1e   : > { %p997_p12 = scmp.ne.s32.totalorder %s1625_s2, %s996_s15  ;;  %p1003_p5 = scmp.lt.u32.totalorder %s996_s15, %s1625_s2 }
  0x20   : > { %p999_p0 = pnand %p1335_p13, %p997_p12 }
  0x22   : > { %p1000_p3 = pneg %p999_p0 }
  0x24   : > { %p1005_p7 = pnand %p1003_p5, %p1000_p3 }
  0x26   : > { %1008 = shalt.err (!%p1005_p7)
}
  0x27   : > { %s1009_s26 = scalar_lea.vmem %s1312_s7, 256  ;;  %p1017_p2 = scmp.lt.s32.totalorder %s1312_s7, %s1312_s7 }
  0x28   : > { %p1010_p9 = scmp.ne.s32.totalorder %s1312_s7, %s1009_s26  ;;  %p1018_p6 = scmp.lt.s32.totalorder %s1009_s26, %s1009_s26 }
  0x2a   : > { %p1012_p10 = pnand %p1010_p9, %p1335_p13  ;;  %p1019_p12 = por %p1018_p6, %p1017_p2 }
  0x2c   : > { %p1013_p1 = pneg %p1012_p10 }
  0x2e   : > { %p1020_p0 = pnand %p1019_p12, %p1013_p1 }
  0x30   : > { %1023 = shalt.err (!%p1020_p0)
}
  0x31   : > { %s1223_s30 = smov 128   ;;  %s1224_s9 = smov 8  }
  0x32   : > { %918 = dma.hbm_to_vmem [thread:$0]  (!%p1319_p11), %s1625_s2, 256, %s1312_s7, [#allocation6], %s1223_s30, %s1223_s30, %s1224_s9  }
  0x33   : > { %s1627_s3 = sld [smem:[#allocation18_spill]] }
  0x39   : > { %s1024_s16 = scalar_lea.hbm %s1627_s3, 512 }
  0x3a   : > { %p1025_p1 = scmp.ne.s32.totalorder %s1627_s3, %s1024_s16  ;;  %p1031_p10 = scmp.lt.u32.totalorder %s1024_s16, %s1627_s3 }
  0x3c   : > { %p1027_p2 = pnand %p1025_p1, %p1335_p13 }
  0x3e   : > { %p1028_p6 = pneg %p1027_p2 }
  0x40   : > { %p1033_p3 = pnand %p1031_p10, %p1028_p6 }
  0x42   : > { %1036 = shalt.err (!%p1033_p3)
}
  0x43   : > { %s1037_s7 = scalar_lea.vmem %s1323_s10, 512  ;;  %p1045_p12 = scmp.lt.s32.totalorder %s1323_s10, %s1323_s10 }
  0x44   : > { %p1038_p5 = scmp.ne.s32.totalorder %s1323_s10, %s1037_s7  ;;  %p1046_p0 = scmp.lt.s32.totalorder %s1037_s7, %s1037_s7 }
  0x46   : > { %p1040_p7 = pnand %p1038_p5, %p1335_p13  ;;  %p1047_p1 = por %p1046_p0, %p1045_p12 }
  0x48   : > { %p1041_p9 = pneg %p1040_p7 }
  0x4a   : > { %p1048_p2 = pnand %p1047_p1, %p1041_p9 }
  0x4c   : > { %1051 = shalt.err (!%p1048_p2)
}
  0x4d   : > { %921 = dma.hbm_to_vmem [thread:$0]  (!%p1319_p11), %s1627_s3, 512, %s1323_s10, [#allocation9], %s1223_s30, %s1223_s30, %s1224_s9  }
  0x4e   : > { %s1628_s4 = sld [smem:[#allocation19_spill]] }
  0x54   : > { %s1052_s16 = scalar_lea.hbm %s1628_s4, 512 }
  0x55   : > { %p1053_p6 = scmp.ne.s32.totalorder %s1628_s4, %s1052_s16  ;;  %p1059_p5 = scmp.lt.u32.totalorder %s1052_s16, %s1628_s4 }
  0x57   : > { %p1055_p10 = pnand %p1053_p6, %p1335_p13 }
  0x59   : > { %p1056_p3 = pneg %p1055_p10 }
  0x5b   : > { %p1061_p7 = pnand %p1059_p5, %p1056_p3 }
  0x5d   : > { %1064 = shalt.err (!%p1061_p7)
}
  0x5e   : > { %s1065_s7 = scalar_lea.vmem %s232_s12, 512  ;;  %p1073_p1 = scmp.lt.s32.totalorder %s232_s12, %s232_s12 }
  0x5f   : > { %p1066_p9 = scmp.ne.s32.totalorder %s232_s12, %s1065_s7  ;;  %p1074_p2 = scmp.lt.s32.totalorder %s1065_s7, %s1065_s7 }
  0x61   : > { %p1068_p12 = pnand %p1066_p9, %p1335_p13  ;;  %p1075_p4 = por %p1074_p2, %p1073_p1 }
  0x63   : > { %p1069_p0 = pneg %p1068_p12 }
  0x65   : > { %p1076_p8 = pnand %p1075_p4, %p1069_p0 }
  0x67   : > { %1079 = shalt.err (!%p1076_p8)
}
  0x68   : > { %924 = dma.hbm_to_vmem [thread:$0]  (!%p1319_p11), %s1628_s4, 512, %s232_s12, [#allocation9], %s1223_s30, %s1223_s30, %s1224_s9  }
  0x69   : > { %s1408_s18 = sadd.s32 1, %s1218_s24   ;;  %s33_s13 = sadd.s32 1, %s1214_s23 }
  0x6a   : > { %s30_s8 = ssub.s32 %s1218_s24, %s1408_s18  ;;  %p40_p8 = scmp.ne.s32.totalorder %s1214_s23, %s1210_s22 }
  0x6b   : > { %p31_p4 = scmp.eq.s32.totalorder %s30_s8, 0  ;;  %p41_p13 = scmp.eq.s32.totalorder %s1218_s24, 0 }
  0x6c   : > { %p939_p6 = scmp.lt.s32.totalorder %s1218_s24, 2  ;;  %p1629_p3 = scmp.eq.s32.totalorder %s1289_s25, 1 }
  0x6d   : > { %s1418_s14 = scalar_select %p31_p4, %s1214_s23, %s33_s13  }
  0x6e   : > { %p42_p10 = por %p41_p13, %p40_p8  ;;  %p1422_p5 = por %p1629_p3, %p40_p8 }
  0x6f   : > { %s248_s16 = sand.u32 1, %s1214_s23   ;;  %s823_s17 = sshll.u32 %s1218_s24, 7 }
  0x70   : > { %s1630_s15 = scalar_select %p1422_p5, 1, 0 }
  0x71   : > { %s1428_s12 = sshll.u32 %s248_s16, 3  ;;  %s1433_s19 = scalar_lea.hbm %s1607_s0, %s823_s17 }
  0x72   : > { %s252_s20 = scalar_lea.vmem [#allocation2], %s1428_s12  ;;  %p1436_p11 = pnand %p939_p6, %p42_p10 }
  0x73   : > { %s259_s26 = sshll.u32 %s252_s20, 4  ;;  %s1445_s8 = scalar_lea.hbm %s1608_s1, %s823_s17  ;;  %s1440_s26 = int_to_ptr.vmem [resolvable:$true] %s259_s26 }
  0x74   : > { %s249_s13 = scalar_lea.sflag [#allocation3], %s248_s16  ;;  %s1080_s30 = scalar_lea.hbm %s1433_s19, 128 }
  0x75   : > { %p1081_p7 = scmp.ne.s32.totalorder %s1433_s19, %s1080_s30  ;;  %p1082_p9 = pneg %p1436_p11 }
  0x76   : > { %s1085_s2 = scalar_lea.hbm %s1607_s0, 256  ;;  %p1086_p1 = scmp.lt.u32.totalorder %s1433_s19, %s1607_s0 }
  0x77   : > { %p1083_p12 = pnand %p1082_p9, %p1081_p7  ;;  %p1087_p2 = scmp.lt.u32.totalorder %s1085_s2, %s1080_s30 }
  0x78   : > { %p1089_p8 = scmp.lt.u32.totalorder %s1080_s30, %s1433_s19 }
  0x79   : > { %p1084_p0 = pneg %p1083_p12  ;;  %p1088_p4 = por %p1087_p2, %p1086_p1 }
  0x7b   : > { %p1090_p13 = por %p1089_p8, %p1088_p4 }
  0x7d   : > { %p1091_p6 = pnand %p1090_p13, %p1084_p0 }
  0x7f   : > { %1094 = shalt.err (!%p1091_p6)
}
  0x80   : > { %s1095_s16 = scalar_lea.vmem %s1440_s26, 128  ;;  %s1225_s17 = smov [#allocation2]  }
  0x81   : > { %p1096_p10 = scmp.ne.s32.totalorder %s1440_s26, %s1095_s16  ;;  %s1100_s10 = sshll.u32 %s1225_s17, 4  ;;  %s1101_s10 = int_to_ptr.vmem [resolvable:$false] %s1100_s10 }
  0x82   : > { %s1102_s3 = scalar_lea.vmem %s1101_s10, 256  ;;  %p1103_p12 = scmp.lt.s32.totalorder %s1440_s26, %s1101_s10 }
  0x83   : > { %p1098_p3 = pnand %p1096_p10, %p1082_p9  ;;  %p1104_p1 = scmp.lt.s32.totalorder %s1102_s3, %s1095_s16 }
  0x85   : > { %p1099_p7 = pneg %p1098_p3  ;;  %p1105_p2 = por %p1104_p1, %p1103_p12 }
  0x87   : > { %p1106_p4 = pnand %p1105_p2, %p1099_p7 }
  0x89   : > { %1109 = shalt.err (!%p1106_p4)
}
  0x8a   : > { %928 = dma.hbm_to_vmem [thread:$0]  (!%p1436_p11), %s1433_s19, 128, %s1440_s26, %s249_s13  }
  0x8b   : > { %s266_s2 = sand.u32 1, %s1218_s24   ;;  %s270_s4 = scalar_lea.vmem [#allocation5], %s1428_s12 }
  0x8c   : > { %s277_s11 = sshll.u32 %s270_s4, 4  ;;  %s267_s30 = scalar_lea.sflag [#allocation6], %s266_s2  ;;  %s278_s11 = int_to_ptr.vmem [resolvable:$true] %s277_s11 }
  0x8d   : > { %s1110_s9 = scalar_lea.hbm %s1445_s8, 128  ;;  %s1115_s17 = scalar_lea.hbm %s1608_s1, 256 }
  0x8e   : > { %p1111_p0 = scmp.ne.s32.totalorder %s1445_s8, %s1110_s9  ;;  %p1116_p6 = scmp.lt.u32.totalorder %s1445_s8, %s1608_s1 }
  0x8f   : > { %p1117_p10 = scmp.lt.u32.totalorder %s1115_s17, %s1110_s9  ;;  %p1119_p7 = scmp.lt.u32.totalorder %s1110_s9, %s1445_s8 }
  0x90   : > { %p1113_p8 = pnand %p1111_p0, %p1082_p9 }
  0x91   : > { %p1118_p3 = por %p1117_p10, %p1116_p6 }
  0x92   : > { %p1114_p13 = pneg %p1113_p8 }
  0x93   : > { %p1120_p12 = por %p1119_p7, %p1118_p3 }
  0x95   : > { %p1121_p1 = pnand %p1120_p12, %p1114_p13 }
  0x97   : > { %1124 = shalt.err (!%p1121_p1)
}
  0x98   : > { %s1125_s12 = scalar_lea.vmem %s278_s11, 128  ;;  %s1226_s19 = smov [#allocation5]  }
  0x99   : > { %p1126_p2 = scmp.ne.s32.totalorder %s278_s11, %s1125_s12  ;;  %s1130_s26 = sshll.u32 %s1226_s19, 4  ;;  %s1131_s26 = int_to_ptr.vmem [resolvable:$false] %s1130_s26 }
  0x9a   : > { %s1132_s13 = scalar_lea.vmem %s1131_s26, 256  ;;  %p1133_p8 = scmp.lt.s32.totalorder %s278_s11, %s1131_s26 }
  0x9b   : > { %p1128_p4 = pnand %p1126_p2, %p1082_p9  ;;  %p1134_p5 = scmp.lt.s32.totalorder %s1132_s13, %s1125_s12 }
  0x9d   : > { %p1129_p0 = pneg %p1128_p4  ;;  %p1135_p6 = por %p1134_p5, %p1133_p8 }
  0x9f   : > { %p1136_p10 = pnand %p1135_p6, %p1129_p0 }
  0xa1   : > { %1139 = shalt.err (!%p1136_p10)
}
  0xa2   : > { %931 = dma.hbm_to_vmem [thread:$0]  (!%p1436_p11), %s1445_s8, 128, %s278_s11, %s267_s30  }
  0xa3   : > { %p1632_p13 = scmp.ne.s32.totalorder %s1623_s29, 0 }
  0xa4   : > { %s1496_s2 = sand.u32 (!%p1632_p13), 1, %s1210_s22   ;;  %p1633_p5 = scmp.ne.s32.totalorder (!%p1632_p13), %s1621_s27, 0 }
  0xa5   : > { %286 = sbr.rel (%p1632_p13) target bundleno = 1077 (0x435), region = 44  ;;  %s1499_s4 = sshll.u32 (!%p1632_p13), %s1496_s2, 3 }
  0xa6   : > { %s289_s9 = scalar_lea.sflag (!%p1632_p13), [#allocation3], %s1496_s2  ;;  %s292_s20 = scalar_lea.vmem (!%p1632_p13), [#allocation2], %s1499_s4 }
  0xac   : > { %1185 = dma.done.wait (%p1633_p5), %s289_s9, 128  }
  0xad   : > { %1187 = vsyncadd (%p1633_p5), %s289_s9, 4294967168  ;;  %s297_s29 = sand.u32 1, %s1289_s25   ;;  %s301_s8 = scalar_lea.vmem [#allocation5], %s1499_s4 }
  0xae   : > { %s298_s7 = scalar_lea.sflag [#allocation6], %s297_s29 }
  0xaf   : > { %1189 = dma.done.wait (%p1633_p5), %s298_s7, 128  }
  0xb0   : > { %1191 = vsyncadd (%p1633_p5), %s298_s7, 4294967168  ;;  %p1634_p11 = scmp.eq.s32.totalorder %s1289_s25, 0 }
  0xb2   : > { %1193 = dma.done.wait (%p1634_p11), [#allocation6], 256   ;;  %p1635_p9 = pmov %p1634_p11 }
  0xb4   : > { %1195 = vsyncadd (%p1635_p9), [#allocation6], 4294967040  ;;  %p1636_p3 = pmov %p1635_p9 }
  0xb6   : > { %1197 = dma.done.wait (%p1636_p3), [#allocation9], 1024   ;;  %p1637_p7 = pmov %p1636_p3 }
  0xb7   : > { %v1227_v0 = vmov 0.0|0.0   ;;  %vm1228_vm0 = vmmov 0   ;;  %v1229_v1 = vmov 0.0   ;;  %v350_v2 = vld [vmem:[#allocation7] sm:$0xff]  ;;  %v351_v3 = vld [vmem:[#allocation7 + $0x8] sm:$0xff]  ;;  %vm356_vm1 = vcmask 130048  }
  0xb8   : > { %1199 = vsyncadd (%p1637_p7), [#allocation9], 4294966272  ;;  %882 = vmatprep.subr.bf16.mxu0 %v1227_v0  ;;  %857 = vmatprep.mubr.msk.f32.mxu0 %vm1228_vm0, %v1229_v1  ;;  %v883_v4 = vpack.c.bf16 %v351_v3, %v350_v2  ;;  %v347_v5 = vld [vmem:[%s292_s20] sm:$0xff]  ;;  %v465_v6 = vld [vmem:[#allocation8] sm:$0xff]  ;;  %v352_v12 = vlaneseq  ;;  %vm430_vm2 = vcmask 261120   ;;  %s1230_s30 = smov 32  }
  0xb9   : > { %885 = vmatprep.subr.bf16.mxu1 %v1227_v0  ;;  %868 = vmatprep.mubr.msk.f32.mxu1 %vm1228_vm0, %v1229_v1  ;;  %v466_v7 = vld [vmem:[#allocation8 + $0x8] sm:$0xff]  ;;  %v467_v8 = vld [vmem:[#allocation8 + $0x10] sm:$0xff]  ;;  %v468_v10 = vld [vmem:[#allocation8 + $0x18] sm:$0xff]  ;;  %s1231_s16 = smov 96   ;;  %s837_s17 = sshll.u32 %s1289_s25, 7 }
  0xba   : > { %884 = vmatpush3.bf16.msra.mxu0 %v883_v4  ;;  %v886_v9 = vpack.c.bf16 %v466_v7, %v465_v6  ;;  %v889_v11 = vpack.c.bf16 %v468_v10, %v467_v8  ;;  %v1525_v13 = vshrl.u32 %v352_v12, 7  ;;  %v1531_v15 = vld [vmem:[%s1612_s5] sm:$0xff]  ;;  %v580_v50 = vld [vmem:[#allocation10] sm:$0xff]  ;;  %v581_v51 = vld [vmem:[#allocation10 + $0x8] sm:$0xff]  ;;  %s346_s10 = scalar_lea.vmem [#allocation11], %s1499_s4  ;;  %s1562_s26 = scalar_lea.hbm %s1613_s6, %s837_s17 }
  0xbb   : > { %891 = vmatprep.subr.bf16.mxu0 %v1227_v0  ;;  %v582_v52 = vld [vmem:[#allocation10 + $0x10] sm:$0xff]  ;;  %v892_v53 = vpack.c.bf16 %v581_v51, %v580_v50  ;;  %v583_v54 = vld [vmem:[#allocation10 + $0x18] sm:$0xff]  ;;  %s695_s3 = sshll.u32 %s346_s10, 4  ;;  %s682_s13 = scalar_lea.sflag [#allocation4], %s1496_s2  ;;  %s1564_s3 = int_to_ptr.vmem [resolvable:$true] %s695_s3 }
  0xbc   : > { %887 = vmatpush3.bf16.msra.mxu1 %v886_v9  ;;  %v354_v14 = vsub.s32 0, %v1525_v13  ;;  %v456_v40 = vsub.s32 1, %v1525_v13  ;;  %v461_v41 = vsub.s32 2, %v1525_v13  ;;  %v895_v55 = vpack.c.bf16 %v583_v54, %v582_v52  ;;  %s1140_s9 = scalar_lea.vmem %s1564_s3, 128  ;;  %p1638_p1 = scmp.ne.s32.totalorder %s1630_s15, 0 }
  0xbd   : > { %858 = vmatmul.mubr.msk.f32.vlgmr.msra.gmra.mrb[0].mxu0 %vm356_vm1, %v347_v5  ;;  %888 = vmatprep.subr.bf16.mxu1 %v1227_v0  ;;  %v664_v56 = vsub.s32 7, %v1525_v13  ;;  %v471_v58 = vsub.s32 3, %v1525_v13  ;;  %p1141_p12 = scmp.ne.s32.totalorder %s1564_s3, %s1140_s9  ;;  %s1232_s25 = smov [#allocation11]  }
  0xbe   : > { %879 = vmatprep.mubr.msk.f32.mxu0 %vm1228_vm0, %v1229_v1  ;;  %v355_v16 = vrot.slane %v1531_v15, %v354_v14  ;;  %v457_v43 = vrot.slane %v1531_v15, %v456_v40  ;;  %v462_v46 = vrot.slane %v1531_v15, %v461_v41  ;;  %893 = vmatpush3.bf16.msra.mxu0 %v892_v53  ;;  %v348_v40 = vld [vmem:[%s301_s8] sm:$0xff]  ;;  %s1144_s4 = sshll.u32 %s1232_s25, 4  ;;  %s1145_s4 = int_to_ptr.vmem [resolvable:$false] %s1144_s4 }
  0xbf   : > { %894 = vmatprep.subr.bf16.mxu0 %v1227_v0  ;;  %v665_v57 = vrot.slane %v1531_v15, %v664_v56  ;;  %v472_v59 = vrot.slane %v1531_v15, %v471_v58  ;;  %p1142_p2 = pnand %p1141_p12, %p1638_p1  ;;  %s1146_s20 = scalar_lea.vmem %s1145_s4, 256 }
  0xc0   : > { %890 = vmatpush3.bf16.msra.mxu1 %v889_v11  ;;  %p1147_p0 = scmp.lt.s32.totalorder %s1564_s3, %s1145_s4  ;;  %p1148_p8 = scmp.lt.s32.totalorder %s1146_s20, %s1140_s9 }
  0xc1   : > { %667 = vrot.lane.b32.xlu0 %v665_v57, %s1230_s30  ;;  %p1143_p4 = pneg %p1142_p2 }
  0xc2   : > { %896 = vmatpush3.bf16.msra.mxu0 %v895_v55  ;;  %p1149_p6 = por %p1148_p8, %p1147_p0 }
  0xc4   : > { %p1150_p10 = pnand %p1149_p6, %p1143_p4 }
 0x190   : > { %v426_v17 = vpop.f32.mrb[0].mxu0 }
 0x191   : > { %v427_v18 = vadd.f32 %v426_v17, %v355_v16  ;;  %v859_v19 = vpop.f32.mrb[1].mxu0 }
 0x193   : > { %v431_v20 = vsel %vm430_vm2, %v427_v18, 0.0  ;;  %v438_v21 = vmul.f32 %v427_v18, %v427_v18 }
 0x194   : > { %v432_v22 = vrot.slane %v431_v20, 4 }
 0x195   : > { %v439_v23 = vsel %vm430_vm2, %v438_v21, 0.0  ;;  %v571_v21 = vsub.s32 4, %v1525_v13 }
 0x196   : > { %v433_v24 = vadd.f32 %v432_v22, %v431_v20  ;;  %v440_v25 = vrot.slane %v439_v23, 4  ;;  %v576_v22 = vsub.s32 5, %v1525_v13 }
 0x198   : > { %v434_v26 = vrot.slane %v433_v24, 2  ;;  %v441_v27 = vadd.f32 %v440_v25, %v439_v23 }
 0x19a   : > { %v435_v28 = vadd.f32 %v434_v26, %v433_v24  ;;  %v442_v29 = vrot.slane %v441_v27, 2  ;;  %v572_v24 = vrot.slane %v1531_v15, %v571_v21 }
 0x19c   : > { %v436_v30 = vrot.slane %v435_v28, 1  ;;  %v443_v31 = vadd.f32 %v442_v29, %v441_v27  ;;  %v577_v27 = vrot.slane %v1531_v15, %v576_v22 }
 0x19e   : > { %v437_v32 = vadd.f32 %v436_v30, %v435_v28  ;;  %v444_v33 = vrot.slane %v443_v31, 1 }
 0x1a0   : > { %v445_v34 = vadd.f32 %v444_v33, %v443_v31  ;;  %v446_v35 = vmul.f32 0.125, %v437_v32  ;;  %v668_v31 = vpop.permute.xlu0 %667 }
 0x1a2   : > { %v447_v36 = vmul.f32 0.125, %v445_v34  ;;  %v448_v37 = vmul.f32 %v446_v35, %v446_v35  ;;  %v450_v42 = vsub.f32 %v427_v18, %v446_v35 }
 0x1a4   : > { %v449_v38 = vsub.f32 %v447_v36, %v448_v37 }
 0x1a6   : > { %v451_v39 = vadd.f32 1e-05, %v449_v38  ;;  %v659_v38 = vsub.s32 6, %v1525_v13 }
 0x1a8   : > { %986 = vrsqrt.f32 %v451_v39  ;;  %v660_v39 = vrot.slane %v1531_v15, %v659_v38 }
 0x1b2   : > { %v987_v44 = vpop.eup %986 }
 0x1b3   : > { %v453_v45 = vmul.f32 %v987_v44, %v450_v42 }
 0x1b5   : > { %v458_v47 = vmul.f32 %v457_v43, %v453_v45 }
 0x1b7   : > { %v463_v48 = vadd.f32 %v462_v46, %v458_v47 }
 0x1b9   : > { %988 = vtanh.f32 %v463_v48 }
 0x1c3   : > { %v989_v49 = vpop.eup %988 }
 0x1c4   : > { %869 = vmatmul.mubr.msk.f32.vlgmr.msra.gmra.mrb[0].mxu1 %vm430_vm2, %v989_v49 }
 0x297   : > { %v542_v60 = vpop.f32.mrb[0].mxu1 }
 0x298   : > { %v543_v61 = vadd.f32 %v542_v60, %v472_v59  ;;  %v870_v62 = vpop.f32.mrb[1].mxu1 }
 0x29a   : > { %v546_v63 = vsel %vm430_vm2, %v543_v61, 0.0  ;;  %v553_v1 = vmul.f32 %v543_v61, %v543_v61 }
 0x29b   : > { %v547_v2 = vrot.slane %v546_v63, 4 }
 0x29c   : > { %v554_v0 = vsel %vm430_vm2, %v553_v1, 0.0 }
 0x29d   : > { %v548_v3 = vadd.f32 %v547_v2, %v546_v63  ;;  %v555_v4 = vrot.slane %v554_v0, 4 }
 0x29f   : > { %v549_v5 = vrot.slane %v548_v3, 2  ;;  %v556_v6 = vadd.f32 %v555_v4, %v554_v0 }
 0x2a1   : > { %v550_v7 = vadd.f32 %v549_v5, %v548_v3  ;;  %v557_v8 = vrot.slane %v556_v6, 2 }
 0x2a3   : > { %v551_v9 = vrot.slane %v550_v7, 1  ;;  %v558_v10 = vadd.f32 %v557_v8, %v556_v6 }
 0x2a5   : > { %v552_v11 = vadd.f32 %v551_v9, %v550_v7  ;;  %v559_v12 = vrot.slane %v558_v10, 1 }
 0x2a7   : > { %v560_v14 = vadd.f32 %v559_v12, %v558_v10  ;;  %v561_v16 = vmul.f32 0.125, %v552_v11 }
 0x2a9   : > { %v562_v17 = vmul.f32 0.125, %v560_v14  ;;  %v563_v18 = vmul.f32 %v561_v16, %v561_v16  ;;  %v565_v23 = vsub.f32 %v543_v61, %v561_v16 }
 0x2ab   : > { %v564_v19 = vsub.f32 %v562_v17, %v563_v18 }
 0x2ad   : > { %v566_v20 = vadd.f32 1e-05, %v564_v19 }
 0x2af   : > { %990 = vrsqrt.f32 %v566_v20 }
 0x2b9   : > { %v991_v25 = vpop.eup %990 }
 0x2ba   : > { %v568_v26 = vmul.f32 %v991_v25, %v565_v23 }
 0x2bc   : > { %v573_v28 = vmul.f32 %v572_v24, %v568_v26 }
 0x2be   : > { %v578_v29 = vadd.f32 %v577_v27, %v573_v28 }
 0x2c0   : > { %992 = vtanh.f32 %v578_v29 }
 0x2ca   : > { %v993_v30 = vpop.eup %992 }
 0x2cb   : > { %880 = vmatmul.mubr.msk.f32.vlgmr.msra.gmra.mrb[2].mxu0 %vm430_vm2, %v993_v30 }
 0x39e   : > { %v653_v32 = vpop.f32.mrb[2].mxu0 }
 0x39f   : > { %v670_v33 = vadd.f32 %v668_v31, %v653_v32  ;;  %v881_v34 = vpop.f32.mrb[3].mxu0  ;;  %v661_v42 = vadd.f32 %v660_v39, %v653_v32 }
 0x3a1   : > { %v671_v35 = vmul.f32 0.5, %v670_v33 }
 0x3a3   : > { %v672_v36 = vmul.f32 1.442695, %v671_v35 }
 0x3a5   : > { %994 = vpow2.f32 %v672_v36 }
 0x3af   : > { %v995_v37 = vpop.eup %994 }
 0x3b0   : > { %675 = vrot.lane.b32.xlu0 %v995_v37, %s1231_s16 }
 0x422   : > { %v676_v41 = vpop.permute.xlu0 %675 }
 0x423   : > { %v678_v43 = vmul.f32 %v676_v41, %v348_v40 }
 0x425   : > { %v679_v44 = vadd.f32 %v678_v43, %v661_v42 }
 0x427   : > { %680 = vst.msk [vmem:[%s346_s10] sm:$0xff] %vm430_vm2, %v679_v44 }
 0x428   : > { %1153 = shalt.err (!%p1150_p10)
}
 0x429   : > { %s1154_s2 = scalar_lea.hbm %s1562_s26, 128  ;;  %s1158_s8 = scalar_lea.hbm %s1613_s6, 256 }
 0x42a   : > { %p1155_p13 = scmp.ne.s32.totalorder %s1562_s26, %s1154_s2  ;;  %p1159_p9 = scmp.lt.u32.totalorder %s1562_s26, %s1613_s6 }
 0x42b   : > { %p1160_p3 = scmp.lt.u32.totalorder %s1158_s8, %s1154_s2  ;;  %p1162_p12 = scmp.lt.u32.totalorder %s1154_s2, %s1562_s26 }
 0x42c   : > { %p1156_p5 = pnand %p1155_p13, %p1638_p1 }
 0x42d   : > { %p1161_p7 = por %p1160_p3, %p1159_p9 }
 0x42e   : > { %p1157_p11 = pneg %p1156_p5 }
 0x42f   : > { %p1163_p2 = por %p1162_p12, %p1161_p7 }
 0x431   : > { %p1164_p4 = pnand %p1163_p2, %p1157_p11 }
 0x433   : > { %1167 = shalt.err (!%p1164_p4)
}
 0x434   : > { %913 = dma.vmem_to_hbm [thread:$0]  (%p1638_p1), %s1564_s3, 128, %s1562_s26, %s682_s13  }
 0x435 PF: > { %s707_s30 = sand.u32 1, %s1206_s21   ;;  %p1639_p0 = scmp.ne.s32.totalorder %s1622_s28, 0 }
 0x436   : > { %p1640_p8 = scmp.ge.s32.totalorder %s1218_s24, 2  ;;  %s708_s16 = scalar_lea.sflag [#allocation4], %s707_s30 }
 0x438   : > { %p933_p6 = pnand %p1640_p8, %p1639_p0 }
 0x43a   : > { %1201 = dma.done.wait (!%p933_p6), %s708_s16, 128  }
 0x43b   : > { %1203 = vsyncadd (!%p933_p6), %s708_s16, 4294967168  ;;  %p23_p10 = scmp.ge.s32.totalorder %s1408_s18, 4   ;;  %s1641_s21 = smov %s1210_s22 }
 0x43c   : > { %s1642_s22 = smov %s1214_s23  ;;  %s1643_s23 = smov %s1418_s14 }
 0x43d   : > { %s1644_s24 = smov %s1408_s18  ;;  %25 = sbr.rel (!%p23_p10) target bundleno = 12 (0xc), region = 114 }
 0x444   :  { %713 = vsyncpa [#allocation3], 1 }
 0x445   :  { %715 = vsyncpa [#allocation3 + $0x1], 1 }
 0x446   :  { %716 = vsyncpa [#allocation6], 1 }
 0x447   :  { %718 = vsyncpa [#allocation6 + $0x1], 1 }
 0x448   :  { %719 = vsyncpa [#allocation9], 1 }
 0x449   :  { %720 = vsyncpa [#allocation4], 1 }
 0x44a   :  { %722 = vsyncpa [#allocation4 + $0x1], 1 }

</bundles_post_ra>
